<compile_context>
chip_gen: v6e
topology: v6e:2x2x1
jax: 0.10.0
libtpu: 0.0.40
codegen_flags: <defaults>
</compile_context>

<pallas_src>
import jax
import jax.numpy as jnp
from jax.experimental import pallas as pl
from jax.experimental.pallas import tpu as pltpu


def _round_up(n, m):
    return -(-n // m) * m


def conv_block_kernel(x_ref, m_ref, w1_ref, b1_ref, w2_ref, b2_ref,
                      wl_ref, bl_ref, o_ref):
    """One batch tile; everything is 2-D and lane-dense.

    x_ref : (bb, C*L)    f32   flattened-NCL activations
    m_ref : (C*L, C*L)   f32   block-diagonal 1/L averaging matrix (LN stats)
    w1    : (C*L, N1p)   bf16  conv1 folded banded matrix, LN affine folded in
    w2    : (N1p, N2p)   bf16  conv2 folded banded matrix (zero padded)
    wl    : (N2p, H)     bf16  final Linear (flatten order fixed, rows padded)
    b1/b2/bl : (1, N1p)/(1, N2p)/(1, H)  f32
    o_ref : (bb, H)      f32
    """
    eps = 1e-5
    xf = x_ref[...]                                            # (bb, CL) f32

    # LayerNorm statistics via tiny MXU matmuls against the block-diagonal
    # averaging matrix (keeps the kernel off the XLU; stats stay in f32).
    mean = jnp.dot(xf, m_ref[...], preferred_element_type=jnp.float32)
    cen = xf - mean
    var = jnp.dot(cen * cen, m_ref[...], preferred_element_type=jnp.float32)
    xn = cen * jax.lax.rsqrt(var + eps)                        # gamma/beta folded into w1/b1

    # Conv stack + Linear as three chained lane-dense MXU matmuls (bf16 operands,
    # f32 accumulation); bias adds and ReLU stay in f32 on the VPU.
    h1 = jnp.dot(xn.astype(jnp.bfloat16), w1_ref[...],
                 preferred_element_type=jnp.float32) + b1_ref[...]
    h1 = jnp.maximum(h1, 0.0)                                  # (bb, N1p)
    h2 = jnp.dot(h1.astype(jnp.bfloat16), w2_ref[...],
                 preferred_element_type=jnp.float32) + b2_ref[...]
    h2 = jnp.maximum(h2, 0.0)                                  # (bb, N2p)
    out = jnp.dot(h2.astype(jnp.bfloat16), wl_ref[...],
                  preferred_element_type=jnp.float32) + bl_ref[...]
    o_ref[...] = out.astype(o_ref.dtype)


def _conv1d_as_dense(w, L_in, in_order):
    """Fold a Conv1d weight (F_out, C_in, K) into a dense matrix acting on a
    flattened input and producing a flattened channels-last output
    (output column index = l_out * F_out + f_out).

    in_order: 'cl' -> input flat index = c * L_in + l  (NCL flatten)
              'lc' -> input flat index = l * C_in + c  (NLC flatten)
    """
    F_out, C_in, K = w.shape
    L_out = L_in - K + 1
    big = jnp.zeros((C_in, L_in, L_out, F_out), jnp.float32)
    for k in range(K):
        shift = jnp.eye(L_in, L_out, k=-k, dtype=jnp.float32)  # 1 at [l_out+k, l_out]
        big = big + shift[None, :, :, None] * w[:, :, k].T[:, None, None, :]
    if in_order == 'lc':
        big = jnp.transpose(big, (1, 0, 2, 3))                  # (L_in, C_in, L_out, F_out)
    return big.reshape(C_in * L_in, L_out * F_out)


def conv_block_forward(x, gamma, beta, w1, b1, w2, b2, wlin, blin, *, block_b=1024):
    """x: (B, C_in, L_in) f32.  Weights in PyTorch layout:
       gamma/beta (L,), w1 (F, C, k0), b1 (F,), w2 (F, F, k1), b2 (F,),
       wlin (H, F*L2), blin (H,)."""
    B, C, L = x.shape
    F, _, K0 = w1.shape
    K1 = w2.shape[2]
    L1 = L - K0 + 1
    L2 = L1 - K1 + 1
    H = wlin.shape[0]
    CL = C * L
    N1, N2 = L1 * F, L2 * F
    N1p, N2p = _round_up(N1, 128), _round_up(N2, 128)

    # ---- static weight transforms (plain JAX, once per parameter set) -------
    # NOTE(guard): the banded fold scales as O(CL*N1) / O(N1*N2).  If production
    # shapes push N1/N2 past ~1-2K, switch conv1/conv2 back to K-tap
    # accumulation (or activation-side im2col) instead of these dense matrices.
    w1_d = _conv1d_as_dense(w1, L, 'cl')                        # (CL, N1), cols ordered l*F+f
    w2_d = _conv1d_as_dense(w2, L1, 'lc')                       # (N1, N2)
    # PyTorch flattens (F, L2) as f*L2+l; kernel's h2 is ordered l*F+f.
    wl_d = jnp.transpose(wlin.reshape(H, F, L2), (2, 1, 0)).reshape(N2, H)

    # Fold the LayerNorm affine into conv1:
    #   (xn*g + b) @ W1 = xn @ (diag(g) W1) + (b @ W1)
    gamma_flat = jnp.tile(gamma.astype(jnp.float32), C)         # index c*L+l -> gamma[l]
    beta_flat = jnp.tile(beta.astype(jnp.float32), C)
    b1_t = jnp.tile(b1.astype(jnp.float32), L1)                 # index l*F+f -> b1[f]
    b2_t = jnp.tile(b2.astype(jnp.float32), L2)
    b1_aff = beta_flat @ w1_d + b1_t
    w1_aff = gamma_flat[:, None] * w1_d

    # Zero-pad intermediate widths to multiples of 128 lanes (exact: padded
    # columns have 0 weight and 0 bias, ReLU(0)=0, padded rows multiply zeros).
    w1_p = jnp.zeros((CL, N1p), jnp.float32).at[:, :N1].set(w1_aff).astype(jnp.bfloat16)
    w2_p = jnp.zeros((N1p, N2p), jnp.float32).at[:N1, :N2].set(w2_d).astype(jnp.bfloat16)
    wl_p = jnp.zeros((N2p, H), jnp.float32).at[:N2, :].set(wl_d).astype(jnp.bfloat16)
    b1_p = jnp.zeros((1, N1p), jnp.float32).at[:, :N1].set(b1_aff)
    b2_p = jnp.zeros((1, N2p), jnp.float32).at[:, :N2].set(b2_t)
    bl_p = blin.astype(jnp.float32).reshape(1, H)

    # Block-diagonal per-channel averaging matrix for the LN statistics.
    m_mat = jnp.kron(jnp.eye(C, dtype=jnp.float32),
                     jnp.ones((L, L), jnp.float32)) / L          # (CL, CL)

    # ---- flatten + batch tiling ---------------------------------------------
    x_flat = x.astype(jnp.float32).reshape(B, CL)                # free view of contiguous NCL

    # Large batch tile (amortizes ~600-cycle per-step overhead), multiple of 8
    # sublanes, and >= 2 grid steps when B allows (feeds both v7x TensorCores).
    bb = min(_round_up(block_b, 8), _round_up(B, 8))
    if B > 8 and pl.cdiv(B, bb) < 2:
        bb = _round_up(pl.cdiv(B, 2), 8)
    n_blk = pl.cdiv(B, bb)
    Bp = n_blk * bb
    if Bp != B:
        # Padded rows are all-zero -> var = 0 -> rsqrt(eps): finite values that
        # are sliced away by out[:B]; benign by construction.
        x_flat = jnp.pad(x_flat, ((0, Bp - B), (0, 0)))

    mm_flops = 2 * Bp * (2 * CL * CL + CL * N1p + N1p * N2p + N2p * H)
    bytes_acc = int(4 * (Bp * CL + Bp * H + m_mat.size + N1p + N2p + H)
                    + 2 * (w1_p.size + w2_p.size + wl_p.size))

    # Scoped-VMEM budget with headroom: >= every chip's default, well under
    # v7x's 64 MiB physical.  (At production shapes, also consider single-
    # buffering the constant weight specs via pipeline_mode=pl.Buffered(1).)
    tile_bytes = (2 * bb * CL * 4 + 2 * bb * H * 4
                  + 2 * (m_mat.size * 4
                         + (w1_p.size + w2_p.size + wl_p.size) * 2
                         + (N1p + N2p + H) * 4)
                  + 8 * bb * max(CL, N1p, N2p) * 4)              # live intermediates
    vmem_limit = int(min(48 * 2**20, max(32 * 2**20, 2 * tile_bytes)))

    out = pl.pallas_call(
        conv_block_kernel,
        out_shape=jax.ShapeDtypeStruct((Bp, H), jnp.float32),
        grid=(n_blk,),
        in_specs=[
            pl.BlockSpec((bb, CL), lambda i: (i, 0)),            # x (pipelined over batch)
            pl.BlockSpec((CL, CL), lambda i: (0, 0)),            # LN averaging matrix
            pl.BlockSpec((CL, N1p), lambda i: (0, 0)),           # conv1 (+LN affine) folded
            pl.BlockSpec((1, N1p), lambda i: (0, 0)),            # b1 (affine folded)
            pl.BlockSpec((N1p, N2p), lambda i: (0, 0)),          # conv2 folded
            pl.BlockSpec((1, N2p), lambda i: (0, 0)),            # b2
            pl.BlockSpec((N2p, H), lambda i: (0, 0)),            # linear
            pl.BlockSpec((1, H), lambda i: (0, 0)),              # blin
        ],
        out_specs=pl.BlockSpec((bb, H), lambda i: (i, 0)),
        compiler_params=pltpu.CompilerParams(
            dimension_semantics=("parallel",),
            vmem_limit_bytes=vmem_limit),
        cost_estimate=pl.CostEstimate(
            flops=mm_flops,
            transcendentals=Bp * CL,
            bytes_accessed=bytes_acc),
    )(x_flat, m_mat, w1_p, b1_p, w2_p, b2_p, wl_p, bl_p)
    return out[:B]


def conv_block_reference(x, gamma, beta, w1, b1, w2, b2, wlin, blin):
    """Pure-JAX mirror of the PyTorch module (NCL layout throughout, f32)."""
    eps = 1e-5
    mean = jnp.mean(x, axis=-1, keepdims=True)
    var = jnp.mean((x - mean) ** 2, axis=-1, keepdims=True)
    xn = (x - mean) / jnp.sqrt(var + eps) * gamma + beta

    def conv1d(h, w, b):
        F_out, C_in, K = w.shape
        Lh = h.shape[-1]
        Lo = Lh - K + 1
        out = jnp.zeros((h.shape[0], F_out, Lo), jnp.float32)
        for k in range(K):
            out = out + jnp.einsum('bcl,fc->bfl', h[:, :, k:k + Lo], w[:, :, k])
        return out + b[None, :, None]

    h1 = jnp.maximum(conv1d(xn, w1, b1), 0.0)
    h2 = jnp.maximum(conv1d(h1, w2, b2), 0.0)
    flat = h2.reshape(h2.shape[0], -1)                           # (B, F*L2), f*L2+l
    return flat @ wlin.T + blin


if __name__ == "__main__":
    # Module hyperparameters (small, consistent with Conv_Block signature)
    B, C_in, L_in = 2, 4, 16
    F, horizon = 8, 5
    kernel = (3, 3)
    conv_layers = 2
    L2 = L_in + conv_layers - sum(kernel)                        # 12

    key = jax.random.PRNGKey(0)
    ks = jax.random.split(key, 9)
    x     = jax.random.normal(ks[0], (B, C_in, L_in), jnp.float32)
    gamma = 1.0 + 0.1 * jax.random.normal(ks[1], (L_in,), jnp.float32)
    beta  = 0.1 * jax.random.normal(ks[2], (L_in,), jnp.float32)
    w1    = 0.2 * jax.random.normal(ks[3], (F, C_in, kernel[0]), jnp.float32)
    b1    = 0.1 * jax.random.normal(ks[4], (F,), jnp.float32)
    w2    = 0.2 * jax.random.normal(ks[5], (F, F, kernel[1]), jnp.float32)
    b2    = 0.1 * jax.random.normal(ks[6], (F,), jnp.float32)
    wlin  = 0.1 * jax.random.normal(ks[7], (horizon, F * L2), jnp.float32)
    blin  = 0.1 * jax.random.normal(ks[8], (horizon,), jnp.float32)

    out = conv_block_forward(x, gamma, beta, w1, b1, w2, b2, wlin, blin)
    out = jax.block_until_ready(out)

    ref = conv_block_reference(x, gamma, beta, w1, b1, w2, b2, wlin, blin)
    assert out.shape == (B, horizon), out.shape
    # bf16 MXU operands with f32 accumulation -> loosened tolerance (per review).
    assert jnp.allclose(out, ref, atol=2e-2, rtol=2e-2), (out, ref)
    print("KERNEL_OK")
</pallas_src>

<mosaic_0001>
module attributes {stable_mosaic.version = 11 : i64} {
  func.func @conv_block_kernel(%arg0: i32, %arg1: memref<8x64xf32, #tpu.memory_space<vmem>>, %arg2: memref<64x64xf32, #tpu.memory_space<vmem>>, %arg3: memref<64x128xbf16, #tpu.memory_space<vmem>>, %arg4: memref<1x128xf32, #tpu.memory_space<vmem>>, %arg5: memref<128x128xbf16, #tpu.memory_space<vmem>>, %arg6: memref<1x128xf32, #tpu.memory_space<vmem>>, %arg7: memref<128x5xbf16, #tpu.memory_space<vmem>>, %arg8: memref<1x5xf32, #tpu.memory_space<vmem>>, %arg9: memref<8x5xf32, #tpu.memory_space<vmem>>) attributes {dimension_semantics = [#tpu.dimension_semantics<parallel>], iteration_bounds = array<i64: 1>, scalar_prefetch = 0 : i64, scratch_operands = 0 : i64, tpu.core_type = #tpu.core_type<tc>, window_params = [{transform_indices = @transform_0, window_bounds = array<i64: 8, 64>}, {pipeline_mode = #tpu.pipeline_mode<synchronous>, transform_indices = @transform_1, window_bounds = array<i64: 64, 64>}, {pipeline_mode = #tpu.pipeline_mode<synchronous>, transform_indices = @transform_2, window_bounds = array<i64: 64, 128>}, {pipeline_mode = #tpu.pipeline_mode<synchronous>, transform_indices = @transform_3, window_bounds = array<i64: 1, 128>}, {pipeline_mode = #tpu.pipeline_mode<synchronous>, transform_indices = @transform_4, window_bounds = array<i64: 128, 128>}, {pipeline_mode = #tpu.pipeline_mode<synchronous>, transform_indices = @transform_5, window_bounds = array<i64: 1, 128>}, {pipeline_mode = #tpu.pipeline_mode<synchronous>, transform_indices = @transform_6, window_bounds = array<i64: 128, 5>}, {pipeline_mode = #tpu.pipeline_mode<synchronous>, transform_indices = @transform_7, window_bounds = array<i64: 1, 5>}, {transform_indices = @transform_8, window_bounds = array<i64: 8, 5>}]} {
    %c0 = arith.constant 0 : index
    %c0_0 = arith.constant 0 : index
    %0 = vector.load %arg1[%c0, %c0_0] : memref<8x64xf32, #tpu.memory_space<vmem>>, vector<8x64xf32>
    %c0_1 = arith.constant 0 : index
    %c0_2 = arith.constant 0 : index
    %1 = vector.load %arg2[%c0_1, %c0_2] : memref<64x64xf32, #tpu.memory_space<vmem>>, vector<64x64xf32>
    %cst = arith.constant dense<0.000000e+00> : vector<8x64xf32>
    %2 = tpu.matmul %0, %1, %cst {dimension_numbers = #tpu.dot_dimension_numbers<[1], [0], [0], [1], [0, 0, 1, 1], [], []>} : vector<8x64xf32>, vector<64x64xf32>, vector<8x64xf32> -> vector<8x64xf32>
    %3 = arith.subf %0, %2 : vector<8x64xf32>
    %4 = arith.mulf %3, %3 : vector<8x64xf32>
    %c0_3 = arith.constant 0 : index
    %c0_4 = arith.constant 0 : index
    %5 = vector.load %arg2[%c0_3, %c0_4] : memref<64x64xf32, #tpu.memory_space<vmem>>, vector<64x64xf32>
    %cst_5 = arith.constant dense<0.000000e+00> : vector<8x64xf32>
    %6 = tpu.matmul %4, %5, %cst_5 {dimension_numbers = #tpu.dot_dimension_numbers<[1], [0], [0], [1], [0, 0, 1, 1], [], []>} : vector<8x64xf32>, vector<64x64xf32>, vector<8x64xf32> -> vector<8x64xf32>
    %cst_6 = arith.constant 9.99999974E-6 : f32
    %7 = vector.broadcast %cst_6 : f32 to vector<8x64xf32>
    %8 = arith.addf %6, %7 : vector<8x64xf32>
    %9 = math.rsqrt %8 : vector<8x64xf32>
    %10 = arith.mulf %3, %9 : vector<8x64xf32>
    %11 = arith.truncf %10 : vector<8x64xf32> to vector<8x64xbf16>
    %c0_7 = arith.constant 0 : index
    %c0_8 = arith.constant 0 : index
    %12 = vector.load %arg3[%c0_7, %c0_8] : memref<64x128xbf16, #tpu.memory_space<vmem>>, vector<64x128xbf16>
    %cst_9 = arith.constant dense<0.000000e+00> : vector<8x128xf32>
    %13 = tpu.matmul %11, %12, %cst_9 {dimension_numbers = #tpu.dot_dimension_numbers<[1], [0], [0], [1], [0, 0, 1, 1], [], []>} : vector<8x64xbf16>, vector<64x128xbf16>, vector<8x128xf32> -> vector<8x128xf32>
    %c0_10 = arith.constant 0 : index
    %c0_11 = arith.constant 0 : index
    %14 = vector.load %arg4[%c0_10, %c0_11] : memref<1x128xf32, #tpu.memory_space<vmem>>, vector<1x128xf32>
    %15 = vector.broadcast %14 : vector<1x128xf32> to vector<8x128xf32>
    %16 = arith.addf %13, %15 : vector<8x128xf32>
    %cst_12 = arith.constant 0.000000e+00 : f32
    %17 = vector.broadcast %cst_12 : f32 to vector<8x128xf32>
    %18 = arith.maximumf %16, %17 : vector<8x128xf32>
    %19 = arith.truncf %18 : vector<8x128xf32> to vector<8x128xbf16>
    %c0_13 = arith.constant 0 : index
    %c0_14 = arith.constant 0 : index
    %20 = vector.load %arg5[%c0_13, %c0_14] : memref<128x128xbf16, #tpu.memory_space<vmem>>, vector<128x128xbf16>
    %cst_15 = arith.constant dense<0.000000e+00> : vector<8x128xf32>
    %21 = tpu.matmul %19, %20, %cst_15 {dimension_numbers = #tpu.dot_dimension_numbers<[1], [0], [0], [1], [0, 0, 1, 1], [], []>} : vector<8x128xbf16>, vector<128x128xbf16>, vector<8x128xf32> -> vector<8x128xf32>
    %c0_16 = arith.constant 0 : index
    %c0_17 = arith.constant 0 : index
    %22 = vector.load %arg6[%c0_16, %c0_17] : memref<1x128xf32, #tpu.memory_space<vmem>>, vector<1x128xf32>
    %23 = vector.broadcast %22 : vector<1x128xf32> to vector<8x128xf32>
    %24 = arith.addf %21, %23 : vector<8x128xf32>
    %cst_18 = arith.constant 0.000000e+00 : f32
    %25 = vector.broadcast %cst_18 : f32 to vector<8x128xf32>
    %26 = arith.maximumf %24, %25 : vector<8x128xf32>
    %27 = arith.truncf %26 : vector<8x128xf32> to vector<8x128xbf16>
    %c0_19 = arith.constant 0 : index
    %c0_20 = arith.constant 0 : index
    %28 = vector.load %arg7[%c0_19, %c0_20] : memref<128x5xbf16, #tpu.memory_space<vmem>>, vector<128x5xbf16>
    %cst_21 = arith.constant dense<0.000000e+00> : vector<8x5xf32>
    %29 = tpu.matmul %27, %28, %cst_21 {dimension_numbers = #tpu.dot_dimension_numbers<[1], [0], [0], [1], [0, 0, 1, 1], [], []>} : vector<8x128xbf16>, vector<128x5xbf16>, vector<8x5xf32> -> vector<8x5xf32>
    %c0_22 = arith.constant 0 : index
    %c0_23 = arith.constant 0 : index
    %30 = vector.load %arg8[%c0_22, %c0_23] : memref<1x5xf32, #tpu.memory_space<vmem>>, vector<1x5xf32>
    %31 = vector.broadcast %30 : vector<1x5xf32> to vector<8x5xf32>
    %32 = arith.addf %29, %31 : vector<8x5xf32>
    %c0_24 = arith.constant 0 : index
    %c0_25 = arith.constant 0 : index
    %33 = vector.load %arg9[%c0_24, %c0_25] : memref<8x5xf32, #tpu.memory_space<vmem>>, vector<8x5xf32>
    tpu.vector_store %arg9[%c0_24, %c0_25], %32 {strides = array<i32>} : memref<8x5xf32, #tpu.memory_space<vmem>>, vector<8x5xf32>,
    return
  }
  func.func @transform_0(%arg0: i32) -> (i32, i32) {
    %c0_i32 = arith.constant 0 : i32
    %c0_i32_0 = arith.constant 0 : i32
    return %arg0, %c0_i32 : i32, i32
  }
  func.func @transform_1(%arg0: i32) -> (i32, i32) {
    %c0_i32 = arith.constant 0 : i32
    %c0_i32_0 = arith.constant 0 : i32
    %c0_i32_1 = arith.constant 0 : i32
    return %c0_i32, %c0_i32_0 : i32, i32
  }
  func.func @transform_2(%arg0: i32) -> (i32, i32) {
    %c0_i32 = arith.constant 0 : i32
    %c0_i32_0 = arith.constant 0 : i32
    %c0_i32_1 = arith.constant 0 : i32
    return %c0_i32, %c0_i32_0 : i32, i32
  }
  func.func @transform_3(%arg0: i32) -> (i32, i32) {
    %c0_i32 = arith.constant 0 : i32
    %c0_i32_0 = arith.constant 0 : i32
    %c0_i32_1 = arith.constant 0 : i32
    return %c0_i32, %c0_i32_0 : i32, i32
  }
  func.func @transform_4(%arg0: i32) -> (i32, i32) {
    %c0_i32 = arith.constant 0 : i32
    %c0_i32_0 = arith.constant 0 : i32
    %c0_i32_1 = arith.constant 0 : i32
    return %c0_i32, %c0_i32_0 : i32, i32
  }
  func.func @transform_5(%arg0: i32) -> (i32, i32) {
    %c0_i32 = arith.constant 0 : i32
    %c0_i32_0 = arith.constant 0 : i32
    %c0_i32_1 = arith.constant 0 : i32
    return %c0_i32, %c0_i32_0 : i32, i32
  }
  func.func @transform_6(%arg0: i32) -> (i32, i32) {
    %c0_i32 = arith.constant 0 : i32
    %c0_i32_0 = arith.constant 0 : i32
    %c0_i32_1 = arith.constant 0 : i32
    return %c0_i32, %c0_i32_0 : i32, i32
  }
  func.func @transform_7(%arg0: i32) -> (i32, i32) {
    %c0_i32 = arith.constant 0 : i32
    %c0_i32_0 = arith.constant 0 : i32
    %c0_i32_1 = arith.constant 0 : i32
    return %c0_i32, %c0_i32_0 : i32, i32
  }
  func.func @transform_8(%arg0: i32) -> (i32, i32) {
    %c0_i32 = arith.constant 0 : i32
    %c0_i32_0 = arith.constant 0 : i32
    return %arg0, %c0_i32 : i32, i32
  }
}

</mosaic_0001>

<bundles_post_ra>
// kernel: tpu_custom_call.1
= control target key start
LH: loop header
LB: loop body
LE: loop exit
PB: predicated region body
PF: predicated region fallthrough
CT: control target
= control target key end

     0   :  { %13 = vsyncpa [#allocation3], 0  ;;  %s1001_s0 = inlined_call_operand.hbm [shape: f32[8,64], index: 0, kind: input, shape index: {}]   ;;  %s1002_s1 = inlined_call_operand.vmem [shape: f32[64,64], index: 1, kind: input, shape index: {}]   ;;  %s1003_s2 = inlined_call_operand.hbm [shape: bf16[64,128], index: 2, kind: input, shape index: {}]   ;;  %s1004_s3 = inlined_call_operand.vmem [shape: f32[1,128], index: 3, kind: input, shape index: {}]   ;;  %s1005_s4 = inlined_call_operand.hbm [shape: bf16[128,128], index: 4, kind: input, shape index: {}]   ;;  %s1006_s5 = inlined_call_operand.vmem [shape: f32[1,128], index: 5, kind: input, shape index: {}]   ;;  %s1007_s6 = inlined_call_operand.vmem [shape: bf16[128,5], index: 6, kind: input, shape index: {}]   ;;  %s1008_s7 = inlined_call_operand.vmem [shape: f32[1,5], index: 7, kind: input, shape index: {}]   ;;  %s1009_s8 = inlined_call_operand.hbm [shape: f32[8,5], index: 8, kind: output, shape index: {}]  }
   0x1   :  { %14 = vsyncpa [#allocation6], 0 }
   0x2   :  { %15 = vsyncpa [#allocation4], 0  ;;  %s830_s27 = smov [#allocation5]  }
   0x3   :  { %s33_s28 = sshll.u32 %s830_s27, 4  ;;  %s34_s28 = int_to_ptr.vmem [resolvable:$true] %s33_s28 }
   0x4   :  { %s752_s29 = scalar_lea.vmem %s34_s28, 512  ;;  %p757_p1 = scmp.lt.s32.totalorder %s34_s28, %s34_s28 }
   0x5   :  { %p753_p0 = scmp.ne.s32.totalorder %s34_s28, %s752_s29  ;;  %p758_p2 = scmp.lt.s32.totalorder %s752_s29, %s752_s29 }
   0x7   :  { %p759_p3 = por %p758_p2, %p757_p1 }
   0x9   :  { %p760_p4 = pnand %p759_p3, %p753_p0 }
   0xb   :  { %763 = shalt.err (!%p760_p4)
}
   0xc   :  { %s831_s30 = smov 64   ;;  %s832_s9 = smov 4  }
   0xd   :  { %39 = dma.hbm_to_vmem [thread:$0]  %s1003_s2, 512, %s34_s28, [#allocation6], %s831_s30, %s831_s30, %s832_s9  }
   0xe   :  { %s833_s12 = smov [#allocation2]   ;;  %s834_s14 = smov [#allocation7]  }
   0xf   :  { %s22_s13 = sshll.u32 %s833_s12, 4  ;;  %s47_s15 = sshll.u32 %s834_s14, 4  ;;  %s23_s13 = int_to_ptr.vmem [resolvable:$true] %s22_s13  ;;  %s48_s15 = int_to_ptr.vmem [resolvable:$true] %s47_s15 }
  0x10   :  { %s772_s16 = scalar_lea.vmem %s23_s13, 128  ;;  %p777_p6 = scmp.lt.s32.totalorder %s23_s13, %s23_s13 }
  0x11   :  { %p773_p5 = scmp.ne.s32.totalorder %s23_s13, %s772_s16  ;;  %p778_p7 = scmp.lt.s32.totalorder %s772_s16, %s772_s16 }
  0x13   :  { %p779_p8 = por %p778_p7, %p777_p6 }
  0x15   :  { %p780_p9 = pnand %p779_p8, %p773_p5 }
  0x17   :  { %783 = shalt.err (!%p780_p9)
}
  0x18   :  { %25 = dma.hbm_to_vmem [thread:$0]  %s1001_s0, 128, %s23_s13, [#allocation3]  }
  0x19   :  { %s792_s19 = scalar_lea.vmem %s48_s15, 1024  ;;  %p797_p11 = scmp.lt.s32.totalorder %s48_s15, %s48_s15 }
  0x1a   :  { %p793_p10 = scmp.ne.s32.totalorder %s48_s15, %s792_s19  ;;  %p798_p12 = scmp.lt.s32.totalorder %s792_s19, %s792_s19 }
  0x1c   :  { %p799_p13 = por %p798_p12, %p797_p11 }
  0x1e   :  { %p800_p0 = pnand %p799_p13, %p793_p10 }
  0x20   :  { %803 = shalt.err (!%p800_p0)
}
  0x21   :  { %53 = dma.hbm_to_vmem [thread:$0]  %s1005_s4, 1024, %s48_s15, [#allocation6], %s831_s30, %s831_s30, %s832_s9  }
  0x22   :  { %824 = dma.done.wait [#allocation3], 128  }
  0x23   :  { %825 = vsyncadd [#allocation3], 4294967168 }
  0x24   :  { %826 = dma.done.wait [#allocation6], 1536  }
  0x25   :  { %827 = vsyncadd [#allocation6], 4294965760  ;;  %v835_v0 = vmov 0.0   ;;  %vm836_vm0 = vmmov 0   ;;  %v78_v1 = vld [vmem:[%s1002_s1 + $0x38] sm:$0xff]  ;;  %v77_v2 = vld [vmem:[%s1002_s1 + $0x30] sm:$0xff] }
  0x26   :  { %624 = vmatprep.subr.mxu0 %v835_v0  ;;  %640 = vmatprep.mubr.msk.f32.mxu0 %vm836_vm0, %v835_v0  ;;  %v76_v3 = vld [vmem:[%s1002_s1 + $0x28] sm:$0xff]  ;;  %v75_v4 = vld [vmem:[%s1002_s1 + $0x20] sm:$0xff]  ;;  %v74_v5 = vld [vmem:[%s1002_s1 + $0x18] sm:$0xff]  ;;  %vm79_vm1 = vcmask 523264   ;;  %s837_s30 = smov [#allocation8]   ;;  %vm539_vm2 = vcmask 39936  }
  0x27   :  { %643 = vmatprep.subr.mxu1 %v835_v0  ;;  %659 = vmatprep.mubr.msk.f32.mxu1 %vm836_vm0, %v835_v0  ;;  %v73_v6 = vld [vmem:[%s1002_s1 + $0x10] sm:$0xff]  ;;  %v72_v7 = vld [vmem:[%s1002_s1 + $0x8] sm:$0xff]  ;;  %v71_v8 = vld [vmem:[%s1002_s1] sm:$0xff]  ;;  %s547_s9 = sshll.u32 %s837_s30, 4  ;;  %s548_s9 = int_to_ptr.vmem [resolvable:$true] %s547_s9 }
  0x28   :  { %625 = vmatpush3.msra.mxu0 %v78_v1  ;;  %644 = vmatpush3.msra.mxu1 %v78_v1  ;;  %v70_v9 = vld [vmem:[#allocation2] sm:$0xff]  ;;  %v723_v15 = vld [vmem:[#allocation5 + $0x10] sm:$0xff]   ;;  %v724_v16 = vld [vmem:[#allocation5 + $0x8] sm:$0xff]   ;;  %p809_p2 = scmp.lt.s32.totalorder %s548_s9, %s548_s9 }
  0x29   :  { %626 = vmatprep.subr.mxu0 %v835_v0  ;;  %645 = vmatprep.subr.mxu1 %v835_v0  ;;  %v722_v14 = vld [vmem:[#allocation5 + $0x18] sm:$0xff]   ;;  %v725_v17 = vld [vmem:[#allocation5] sm:$0xff]   ;;  %v727_v19 = vld [vmem:[#allocation7 + $0x30] sm:$0xff]  }
  0x2a   :  { %627 = vmatpush3.msra.mxu0 %v77_v2  ;;  %646 = vmatpush3.msra.mxu1 %v77_v2  ;;  %v726_v18 = vld [vmem:[#allocation7 + $0x38] sm:$0xff]   ;;  %v728_v20 = vld [vmem:[#allocation7 + $0x28] sm:$0xff]   ;;  %v729_v21 = vld [vmem:[#allocation7 + $0x20] sm:$0xff]  }
  0x2b   :  { %628 = vmatprep.subr.mxu0 %v835_v0  ;;  %647 = vmatprep.subr.mxu1 %v835_v0  ;;  %v730_v22 = vld [vmem:[#allocation7 + $0x18] sm:$0xff]   ;;  %v731_v23 = vld [vmem:[#allocation7 + $0x10] sm:$0xff]   ;;  %v732_v30 = vld [vmem:[#allocation7 + $0x8] sm:$0xff]  }
  0x2c   :  { %629 = vmatpush3.msra.mxu0 %v76_v3  ;;  %648 = vmatpush3.msra.mxu1 %v76_v3  ;;  %v733_v31 = vld [vmem:[#allocation7] sm:$0xff]   ;;  %v734_v32 = vld [vmem:[%s1007_s6 + $0x38] sm:$0xff]   ;;  %v735_v33 = vld [vmem:[%s1007_s6 + $0x30] sm:$0xff]  }
  0x2d   :  { %630 = vmatprep.subr.mxu0 %v835_v0  ;;  %649 = vmatprep.subr.mxu1 %v835_v0  ;;  %v736_v34 = vld [vmem:[%s1007_s6 + $0x28] sm:$0xff]   ;;  %v737_v35 = vld [vmem:[%s1007_s6 + $0x20] sm:$0xff]   ;;  %v738_v36 = vld [vmem:[%s1007_s6 + $0x18] sm:$0xff]  }
  0x2e   :  { %631 = vmatpush3.msra.mxu0 %v75_v4  ;;  %650 = vmatpush3.msra.mxu1 %v75_v4  ;;  %v739_v37 = vld [vmem:[%s1007_s6 + $0x10] sm:$0xff]   ;;  %v559_v38 = vld [vmem:[%s1004_s3] ss:$0 sm:$0xff]  ;;  %v740_v46 = vld [vmem:[%s1007_s6 + $0x8] sm:$0xff]  }
  0x2f   :  { %632 = vmatprep.subr.mxu0 %v835_v0  ;;  %651 = vmatprep.subr.mxu1 %v835_v0  ;;  %v741_v47 = vld [vmem:[%s1007_s6] sm:$0xff]  }
  0x30   :  { %633 = vmatpush3.msra.mxu0 %v74_v5  ;;  %652 = vmatpush3.msra.mxu1 %v74_v5  ;;  %v565_v48 = vld [vmem:[%s1006_s5] ss:$0 sm:$0xff]  ;;  %s804_s5 = scalar_lea.vmem %s548_s9, 128 }
  0x31   :  { %634 = vmatprep.subr.mxu0 %v835_v0  ;;  %653 = vmatprep.subr.mxu1 %v835_v0  ;;  %v574_v56 = vld [vmem:[%s1008_s7] ss:$0 sm:$0xff]  ;;  %p805_p1 = scmp.ne.s32.totalorder %s548_s9, %s804_s5  ;;  %p810_p3 = scmp.lt.s32.totalorder %s804_s5, %s804_s5 }
  0x32   :  { %635 = vmatpush3.msra.mxu0 %v73_v6  ;;  %654 = vmatpush3.msra.mxu1 %v73_v6 }
  0x33   :  { %636 = vmatprep.subr.mxu0 %v835_v0  ;;  %655 = vmatprep.subr.mxu1 %v835_v0  ;;  %p811_p4 = por %p810_p3, %p809_p2 }
  0x34   :  { %637 = vmatpush3.msra.mxu0 %v72_v7  ;;  %656 = vmatpush3.msra.mxu1 %v72_v7 }
  0x35   :  { %638 = vmatprep.subr.mxu0 %v835_v0  ;;  %657 = vmatprep.subr.mxu1 %v835_v0  ;;  %p812_p5 = pnand %p811_p4, %p805_p1 }
  0x36   :  { %639 = vmatpush3.msra.mxu0 %v71_v8  ;;  %658 = vmatpush3.msra.mxu1 %v71_v8 }
  0x37   :  { %641 = vmatmul.mubr.msk.f32.vlgmr.msra.gmra.mxu0 %vm79_vm1, %v70_v9  ;;  %662 = vmatprep.subr.bf16.mxu0 %v835_v0 }
  0x38   :  { %670 = vmatprep.mubr.msk.bf16.mxu0 %vm836_vm0, %v835_v0  ;;  %674 = vmatprep.subr.bf16.mxu1 %v835_v0 }
  0x39   :  { %663 = vmatpush3.bf16.msra.mxu0 %v722_v14 }
  0x3a   :  { %664 = vmatprep.subr.bf16.mxu0 %v835_v0 }
  0x3d   :  { %665 = vmatpush3.bf16.msra.mxu0 %v723_v15 }
  0x3e   :  { %666 = vmatprep.subr.bf16.mxu0 %v835_v0 }
  0x41   :  { %667 = vmatpush3.bf16.msra.mxu0 %v724_v16 }
  0x42   :  { %668 = vmatprep.subr.bf16.mxu0 %v835_v0 }
  0x45   :  { %669 = vmatpush3.bf16.msra.mxu0 %v725_v17 }
  0x46   :  { %694 = vmatprep.subr.bf16.mxu0 %v835_v0 }
  0xf7   :  { %v149_v10 = vpop.f32.mrf.mxu0 }
  0xf8   :  { %v153_v11 = vsub.f32 %v70_v9, %v149_v10 }
  0xf9   :  { %v642_v12 = vpop.f32.mrf.mxu0 }
  0xfa   :  { %v154_v13 = vmul.f32 %v153_v11, %v153_v11 }
  0xfc   :  { %660 = vmatmul.mubr.msk.f32.vlgmr.msra.gmra.mxu1 %vm79_vm1, %v154_v13 }
  0xfd   :  { %690 = vmatprep.mubr.msk.bf16.mxu1 %vm836_vm0, %v835_v0  ;;  %675 = vmatpush3.bf16.msra.mxu1 %v726_v18 }
  0xfe   :  { %676 = vmatprep.subr.bf16.mxu1 %v835_v0 }
 0x101   :  { %677 = vmatpush3.bf16.msra.mxu1 %v727_v19 }
 0x102   :  { %678 = vmatprep.subr.bf16.mxu1 %v835_v0 }
 0x105   :  { %679 = vmatpush3.bf16.msra.mxu1 %v728_v20 }
 0x106   :  { %680 = vmatprep.subr.bf16.mxu1 %v835_v0 }
 0x109   :  { %681 = vmatpush3.bf16.msra.mxu1 %v729_v21 }
 0x10a   :  { %682 = vmatprep.subr.bf16.mxu1 %v835_v0 }
 0x10d   :  { %683 = vmatpush3.bf16.msra.mxu1 %v730_v22 }
 0x10e   :  { %684 = vmatprep.subr.bf16.mxu1 %v835_v0 }
 0x111   :  { %685 = vmatpush3.bf16.msra.mxu1 %v731_v23 }
 0x112   :  { %686 = vmatprep.subr.bf16.mxu1 %v835_v0 }
 0x115   :  { %687 = vmatpush3.bf16.msra.mxu1 %v732_v30 }
 0x116   :  { %688 = vmatprep.subr.bf16.mxu1 %v835_v0 }
 0x119   :  { %689 = vmatpush3.bf16.msra.mxu1 %v733_v31 }
 0x1bc   :  { %v224_v24 = vpop.f32.mrf.mxu1 }
 0x1bd   :  { %v225_v25 = vadd.f32 1e-05, %v224_v24 }
 0x1be   :  { %v661_v26 = vpop.f32.mrf.mxu1 }
 0x1bf   :  { %742 = vrsqrt.f32 %v225_v25 }
 0x1cc   :  { %v743_v27 = vpop.eup %742 }
 0x1cd   :  { %v229_v28 = vmul.f32 %v743_v27, %v153_v11 }
 0x1cf   :  { %v230_v29 = vpack.c.bf16 %v229_v28, %v229_v28 }
 0x1d1   :  { %671 = vmatmul.mubr.msk.bf16.vlgmr.msra.gmra.mxu0 %vm79_vm1, %v230_v29 }
 0x1d2   :  { %710 = vmatprep.mubr.msk.bf16.mxu0 %vm836_vm0, %v835_v0  ;;  %695 = vmatpush3.bf16.msra.mxu0 %v734_v32 }
 0x1d3   :  { %696 = vmatprep.subr.bf16.mxu0 %v835_v0 }
 0x1d6   :  { %697 = vmatpush3.bf16.msra.mxu0 %v735_v33 }
 0x1d7   :  { %698 = vmatprep.subr.bf16.mxu0 %v835_v0 }
 0x1da   :  { %699 = vmatpush3.bf16.msra.mxu0 %v736_v34 }
 0x1db   :  { %700 = vmatprep.subr.bf16.mxu0 %v835_v0 }
 0x1de   :  { %701 = vmatpush3.bf16.msra.mxu0 %v737_v35 }
 0x1df   :  { %702 = vmatprep.subr.bf16.mxu0 %v835_v0 }
 0x1e2   :  { %703 = vmatpush3.bf16.msra.mxu0 %v738_v36 }
 0x1e3   :  { %704 = vmatprep.subr.bf16.mxu0 %v835_v0 }
 0x1e6   :  { %705 = vmatpush3.bf16.msra.mxu0 %v739_v37 }
 0x1e7   :  { %706 = vmatprep.subr.bf16.mxu0 %v835_v0 }
 0x1ea   :  { %707 = vmatpush3.bf16.msra.mxu0 %v740_v46 }
 0x1eb   :  { %708 = vmatprep.subr.bf16.mxu0 %v835_v0 }
 0x1ee   :  { %709 = vmatpush3.bf16.msra.mxu0 %v741_v47 }
 0x291   :  { %v307_v39 = vpop.f32.mrf.mxu0 }
 0x292   :  { %v308_v40 = vadd.f32 %v559_v38, %v307_v39 }
 0x293   :  { %v672_v41 = vpop.f32.mrf.mxu0 }
 0x294   :  { %v313_v42 = vmax.f32 %v308_v40, 0.0 }
 0x295   :  { %v310_v43 = vpop.f32.mrf.mxu0 }
 0x296   :  { %v314_v44 = vpack.c.bf16 %v313_v42, %v313_v42 }
 0x297   :  { %v673_v45 = vpop.f32.mrf.mxu0 }
 0x298   :  { %691 = vmatmul.mubr.bf16.vlgmr.msra.gmra.mxu1 %v314_v44 }
 0x358   :  { %v420_v49 = vpop.f32.mrf.mxu1 }
 0x359   :  { %v421_v50 = vadd.f32 %v565_v48, %v420_v49 }
 0x35a   :  { %v692_v51 = vpop.f32.mrf.mxu1 }
 0x35b   :  { %v426_v52 = vmax.f32 %v421_v50, 0.0 }
 0x35c   :  { %v423_v53 = vpop.f32.mrf.mxu1 }
 0x35d   :  { %v427_v54 = vpack.c.bf16 %v426_v52, %v426_v52 }
 0x35e   :  { %v693_v55 = vpop.f32.mrf.mxu1 }
 0x35f   :  { %711 = vmatmul.mubr.bf16.vlgmr.msra.gmra.mxu0 %v427_v54 }
 0x41f   :  { %v533_v57 = vpop.f32.mrf.mxu0 }
 0x420   :  { %v534_v58 = vadd.f32 %v574_v56, %v533_v57 }
 0x421   :  { %v712_v59 = vpop.f32.mrf.mxu0 }
 0x422   :  { %540 = vst.msk [vmem:[#allocation8] sm:$0xff] %vm539_vm2, %v534_v58 }
 0x423   :  { %v536_v60 = vpop.f32.mrf.mxu0 }
 0x424   :  { %815 = shalt.err (!%p812_p5)
}
 0x425   :  { %550 = dma.vmem_to_hbm [thread:$0]  %s548_s9, 128, %s1009_s8, [#allocation4]   ;;  %v713_v61 = vpop.f32.mrf.mxu0 }
 0x426   :  { %828 = dma.done.wait [#allocation4], 128  }
 0x427   :  { %829 = vsyncadd [#allocation4], 4294967168 }
 0x428   :  { %554 = vsyncpa [#allocation3], 1 }
 0x429   :  { %555 = vsyncpa [#allocation6], 1 }
 0x42a   :  { %556 = vsyncpa [#allocation4], 1 }

</bundles_post_ra>
